<compile_context>
chip_gen: v5e
topology: v5e:2x2
jax: 0.10.0
libtpu: 0.0.40
codegen_flags: <defaults>
</compile_context>

<pallas_src>
import functools

import jax
import jax.numpy as jnp
from jax.experimental import pallas as pl
from jax.experimental.pallas import tpu as pltpu

IN_FEATURES = 24
HIDDEN = 512
BN_EPS = 1e-5
TILE_B_MAX = 1024          # batch rows per grid tile for large batches


def _discriminator_kernel(x_ref, w1_ref, b1_ref, gamma_ref, beta_ref,
                          w2_ref, b2_ref, o_ref, sum_ref, ssq_ref,
                          *, n_data, n_div, needs_mask):
    """grid = (2, T). axis 0: pass (0 = BN stats, 1 = normalize + output)."""
    p = pl.program_id(0)
    t = pl.program_id(1)
    tile_b = x_ref.shape[0]

    b1 = b1_ref[...]
    # Linear(in_features -> 512): bf16 MXU matmul, f32 accumulate.
    h = jnp.dot(x_ref[...].astype(jnp.bfloat16), w1_ref[...],
                preferred_element_type=jnp.float32) + b1          # [tile_b, 512]

    # ---- pass 0: accumulate batch statistics --------------------------------
    @pl.when(jnp.logical_and(p == 0, t == 0))
    def _init():
        if n_div > n_data:
            # torch B==1 branch: one virtual zero-input row whose hidden is b1.
            extra = float(n_div - n_data)
            sum_ref[...] = extra * b1
            ssq_ref[...] = extra * (b1 * b1)
        else:
            sum_ref[...] = jnp.zeros_like(sum_ref)
            ssq_ref[...] = jnp.zeros_like(ssq_ref)

    @pl.when(p == 0)
    def _stats():
        if needs_mask:
            row = t * tile_b + jax.lax.broadcasted_iota(jnp.int32, (tile_b, 1), 0)
            hv = jnp.where(row < n_data, h, 0.0)
        else:
            hv = h
        sum_ref[...] += jnp.sum(hv, axis=0, keepdims=True)
        ssq_ref[...] += jnp.sum(hv * h, axis=0, keepdims=True)     # masked h*h
        o_ref[...] = jnp.zeros_like(o_ref)   # deterministic writeback for pass 0

    # ---- pass 1: BN -> ReLU -> 512->1 reduction -> sigmoid ------------------
    @pl.when(p == 1)
    def _finalize():
        inv_n = 1.0 / float(n_div)
        mean = sum_ref[...] * inv_n                                # [1, 512]
        var = jnp.maximum(ssq_ref[...] * inv_n - mean * mean, 0.0)
        scale = gamma_ref[...] * jax.lax.rsqrt(var + BN_EPS)
        shift = beta_ref[...] - mean * scale
        a = jnp.maximum(h * scale + shift, 0.0)                    # BN + ReLU
        # Linear(512 -> 1) as a VPU multiply + lane reduction (w2 is (1, 512)).
        logit = jnp.sum(a * w2_ref[...], axis=-1, keepdims=True) + b2_ref[...]
        o_ref[...] = jax.nn.sigmoid(logit)


def _round_up(n, m):
    return ((n + m - 1) // m) * m


def discriminator_forward(x, params, *, tile_b=None):
    """x: [B, in_features] float32. Returns [B, 1] sigmoid outputs."""
    B, F = x.shape
    n_div = 2 if B == 1 else B          # BN divisor (torch pads one zero row at B==1)

    if tile_b is None:
        tile_b = min(B, TILE_B_MAX)
    if tile_b >= B:
        tile_b, P = B, B                # single full-array tile, no padding needed
    else:
        tile_b = _round_up(tile_b, 8)   # sublane-aligned batch tile
        P = _round_up(B, tile_b)

    x_p = x if P == B else jnp.zeros((P, F), x.dtype).at[:B].set(x)
    num_tiles = P // tile_b

    kernel = functools.partial(_discriminator_kernel,
                               n_data=B, n_div=n_div, needs_mask=(P != B))

    param_bytes = F * HIDDEN * 2 + 4 * HIDDEN * 4 + 4
    cost = pl.CostEstimate(
        flops=2 * (2 * P * F * HIDDEN) + 8 * P * HIDDEN,
        transcendentals=P + HIDDEN,
        bytes_accessed=2 * P * F * 4 + P * 4 + 2 * param_bytes,
    )

    out = pl.pallas_call(
        kernel,
        out_shape=jax.ShapeDtypeStruct((P, 1), jnp.float32),
        grid=(2, num_tiles),
        in_specs=[
            pl.BlockSpec((tile_b, F), lambda p, t: (t, 0)),        # x
            pl.BlockSpec((F, HIDDEN), lambda p, t: (0, 0)),        # w1 (bf16)
            pl.BlockSpec((1, HIDDEN), lambda p, t: (0, 0)),        # b1
            pl.BlockSpec((1, HIDDEN), lambda p, t: (0, 0)),        # gamma
            pl.BlockSpec((1, HIDDEN), lambda p, t: (0, 0)),        # beta
            pl.BlockSpec((1, HIDDEN), lambda p, t: (0, 0)),        # w2
            pl.BlockSpec((1, 1), lambda p, t: (0, 0)),             # b2
        ],
        out_specs=pl.BlockSpec((tile_b, 1), lambda p, t: (t, 0)),
        scratch_shapes=[pltpu.VMEM((1, HIDDEN), jnp.float32),      # sum(h)
                        pltpu.VMEM((1, HIDDEN), jnp.float32)],     # sum(h*h)
        compiler_params=pltpu.CompilerParams(
            dimension_semantics=("arbitrary", "arbitrary")),
        cost_estimate=cost,
    )(x_p, params["w1"], params["b1"], params["gamma"], params["beta"],
      params["w2"], params["b2"])

    return out if P == B else out[:B]


def init_params(key, in_features=IN_FEATURES, hidden=HIDDEN):
    """Shapes matching the torch module, stored in kernel-friendly layouts.

    w1 is pre-transposed to (in, hidden) and stored bf16 (MXU input);
    w2 is stored (1, hidden) so the 512->1 projection is a lane reduction;
    BatchNorm1d: gamma=1, beta=0; Linear init ~ U(-1/sqrt(fan_in), 1/sqrt(fan_in)).
    """
    k1, k2, k3, k4 = jax.random.split(key, 4)
    lim1 = 1.0 / float(in_features) ** 0.5
    lim2 = 1.0 / float(hidden) ** 0.5
    w1 = jax.random.uniform(k1, (in_features, hidden), jnp.float32, -lim1, lim1)
    b1 = jax.random.uniform(k2, (1, hidden), jnp.float32, -lim1, lim1)
    w2 = jax.random.uniform(k3, (1, hidden), jnp.float32, -lim2, lim2)
    b2 = jax.random.uniform(k4, (1, 1), jnp.float32, -lim2, lim2)
    return dict(
        w1=w1.astype(jnp.bfloat16),
        b1=b1,
        gamma=jnp.ones((1, hidden), jnp.float32),
        beta=jnp.zeros((1, hidden), jnp.float32),
        w2=w2,
        b2=b2,
    )


def _reference(x, params):
    """Pure-JAX reference mirroring the torch forward (f32 matmuls)."""
    w1 = params["w1"].astype(jnp.float32)
    h = x.astype(jnp.float32) @ w1 + params["b1"]
    # torch B==1 branch: a zero input row whose hidden activation is exactly b1.
    hs = jnp.concatenate([h, params["b1"]], axis=0) if x.shape[0] == 1 else h
    mean = jnp.mean(hs, axis=0, keepdims=True)
    var = jnp.mean((hs - mean) ** 2, axis=0, keepdims=True)
    a = jnp.maximum((h - mean) * jax.lax.rsqrt(var + BN_EPS)
                    * params["gamma"] + params["beta"], 0.0)
    logit = jnp.sum(a * params["w2"], axis=-1, keepdims=True) + params["b2"]
    return jax.nn.sigmoid(logit)


# TODO(synk): ReverseLayer only negates gradients in backward; forward is identity,
# so no kernel op is emitted for it.

if __name__ == "__main__":
    key = jax.random.PRNGKey(0)
    k_param, k_x8, k_x16, k_x20 = jax.random.split(key, 4)
    params = init_params(k_param)

    # Standard batch.
    x8 = jax.random.normal(k_x8, (8, IN_FEATURES), jnp.float32)
    y8 = discriminator_forward(x8, params)
    jax.block_until_ready(y8)
    assert y8.shape == (8, 1), y8.shape
    assert bool(jnp.all((y8 >= 0.0) & (y8 <= 1.0)))
    assert jnp.allclose(y8, _reference(x8, params), atol=2e-2, rtol=2e-2)

    # torch B == 1 branch (virtual zero row handled inside the kernel).
    y1 = discriminator_forward(x8[:1], params)
    jax.block_until_ready(y1)
    assert y1.shape == (1, 1), y1.shape
    assert jnp.allclose(y1, _reference(x8[:1], params), atol=2e-2, rtol=2e-2)

    # Multi-tile grid over the batch axis (scratch-accumulated BN stats).
    x16 = jax.random.normal(k_x16, (16, IN_FEATURES), jnp.float32)
    y16 = discriminator_forward(x16, params, tile_b=8)
    jax.block_until_ready(y16)
    assert y16.shape == (16, 1), y16.shape
    assert jnp.allclose(y16, _reference(x16, params), atol=2e-2, rtol=2e-2)

    # Ragged batch: padded rows masked out of the batch statistics.
    x20 = jax.random.normal(k_x20, (20, IN_FEATURES), jnp.float32)
    y20 = discriminator_forward(x20, params, tile_b=8)
    jax.block_until_ready(y20)
    assert y20.shape == (20, 1), y20.shape
    assert jnp.allclose(y20, _reference(x20, params), atol=2e-2, rtol=2e-2)

    print("KERNEL_OK")
</pallas_src>

<mosaic_0001>
module attributes {stable_mosaic.version = 11 : i64} {
  func.func @_discriminator_kernel(%arg0: i32, %arg1: i32, %arg2: memref<8x24xf32, #tpu.memory_space<vmem>>, %arg3: memref<24x512xbf16, #tpu.memory_space<vmem>>, %arg4: memref<1x512xf32, #tpu.memory_space<vmem>>, %arg5: memref<1x512xf32, #tpu.memory_space<vmem>>, %arg6: memref<1x512xf32, #tpu.memory_space<vmem>>, %arg7: memref<1x512xf32, #tpu.memory_space<vmem>>, %arg8: memref<1x1xf32, #tpu.memory_space<vmem>>, %arg9: memref<8x1xf32, #tpu.memory_space<vmem>>, %arg10: memref<1x512xf32, #tpu.memory_space<vmem>>, %arg11: memref<1x512xf32, #tpu.memory_space<vmem>>) attributes {dimension_semantics = [#tpu.dimension_semantics<arbitrary>, #tpu.dimension_semantics<arbitrary>], iteration_bounds = array<i64: 2, 1>, scalar_prefetch = 0 : i64, scratch_operands = 2 : i64, tpu.core_type = #tpu.core_type<tc>, window_params = [{transform_indices = @transform_0, window_bounds = array<i64: 8, 24>}, {pipeline_mode = #tpu.pipeline_mode<synchronous>, transform_indices = @transform_1, window_bounds = array<i64: 24, 512>}, {pipeline_mode = #tpu.pipeline_mode<synchronous>, transform_indices = @transform_2, window_bounds = array<i64: 1, 512>}, {pipeline_mode = #tpu.pipeline_mode<synchronous>, transform_indices = @transform_3, window_bounds = array<i64: 1, 512>}, {pipeline_mode = #tpu.pipeline_mode<synchronous>, transform_indices = @transform_4, window_bounds = array<i64: 1, 512>}, {pipeline_mode = #tpu.pipeline_mode<synchronous>, transform_indices = @transform_5, window_bounds = array<i64: 1, 512>}, {pipeline_mode = #tpu.pipeline_mode<synchronous>, transform_indices = @transform_6, window_bounds = array<i64: 1, 1>}, {transform_indices = @transform_7, window_bounds = array<i64: 8, 1>}]} {
    %c0 = arith.constant 0 : index
    %c0_0 = arith.constant 0 : index
    %0 = vector.load %arg4[%c0, %c0_0] : memref<1x512xf32, #tpu.memory_space<vmem>>, vector<1x512xf32>
    %c0_1 = arith.constant 0 : index
    %c0_2 = arith.constant 0 : index
    %1 = vector.load %arg2[%c0_1, %c0_2] : memref<8x24xf32, #tpu.memory_space<vmem>>, vector<8x24xf32>
    %2 = arith.truncf %1 : vector<8x24xf32> to vector<8x24xbf16>
    %c0_3 = arith.constant 0 : index
    %c0_4 = arith.constant 0 : index
    %3 = vector.load %arg3[%c0_3, %c0_4] : memref<24x512xbf16, #tpu.memory_space<vmem>>, vector<24x512xbf16>
    %cst = arith.constant dense<0.000000e+00> : vector<8x512xf32>
    %4 = tpu.matmul %2, %3, %cst {dimension_numbers = #tpu.dot_dimension_numbers<[1], [0], [0], [1], [0, 0, 1, 1], [], []>} : vector<8x24xbf16>, vector<24x512xbf16>, vector<8x512xf32> -> vector<8x512xf32>
    %5 = vector.broadcast %0 : vector<1x512xf32> to vector<8x512xf32>
    %6 = arith.addf %4, %5 : vector<8x512xf32>
    %c0_i32 = arith.constant 0 : i32
    %7 = arith.cmpi eq, %arg0, %c0_i32 : i32
    %c0_i32_5 = arith.constant 0 : i32
    %8 = arith.cmpi eq, %arg1, %c0_i32_5 : i32
    %9 = arith.andi %7, %8 : i1
    %10 = arith.extui %9 : i1 to i32
    %c0_i32_6 = arith.constant 0 : i32
    %11 = arith.cmpi ne, %10, %c0_i32_6 : i32
    scf.if %11 {
      %cst_10 = arith.constant 0.000000e+00 : f32
      %18 = vector.broadcast %cst_10 : f32 to vector<1x512xf32>
      %c0_11 = arith.constant 0 : index
      %c0_12 = arith.constant 0 : index
      %19 = vector.load %arg10[%c0_11, %c0_12] : memref<1x512xf32, #tpu.memory_space<vmem>>, vector<1x512xf32>
      tpu.vector_store %arg10[%c0_11, %c0_12], %18 {strides = array<i32>} : memref<1x512xf32, #tpu.memory_space<vmem>>, vector<1x512xf32>,
      %cst_13 = arith.constant 0.000000e+00 : f32
      %20 = vector.broadcast %cst_13 : f32 to vector<1x512xf32>
      %c0_14 = arith.constant 0 : index
      %c0_15 = arith.constant 0 : index
      %21 = vector.load %arg11[%c0_14, %c0_15] : memref<1x512xf32, #tpu.memory_space<vmem>>, vector<1x512xf32>
      tpu.vector_store %arg11[%c0_14, %c0_15], %20 {strides = array<i32>} : memref<1x512xf32, #tpu.memory_space<vmem>>, vector<1x512xf32>,
    } else {
    }
    %c0_i32_7 = arith.constant 0 : i32
    %12 = arith.cmpi eq, %arg0, %c0_i32_7 : i32
    %13 = arith.extui %12 : i1 to i32
    %c0_i32_8 = arith.constant 0 : i32
    %14 = arith.cmpi ne, %13, %c0_i32_8 : i32
    scf.if %14 {
      %c0_10 = arith.constant 0 : index
      %c0_11 = arith.constant 0 : index
      %18 = vector.load %arg10[%c0_10, %c0_11] : memref<1x512xf32, #tpu.memory_space<vmem>>, vector<1x512xf32>
      %cst_12 = arith.constant dense<0.000000e+00> : vector<512xf32>
      %19 = vector.multi_reduction <add>, %6, %cst_12 [0] : vector<8x512xf32> to vector<512xf32>
      %20 = vector.shape_cast %19 : vector<512xf32> to vector<1x512xf32>
      %21 = arith.addf %18, %20 : vector<1x512xf32>
      %c0_13 = arith.constant 0 : index
      %c0_14 = arith.constant 0 : index
      %22 = vector.load %arg10[%c0_13, %c0_14] : memref<1x512xf32, #tpu.memory_space<vmem>>, vector<1x512xf32>
      tpu.vector_store %arg10[%c0_13, %c0_14], %21 {strides = array<i32>} : memref<1x512xf32, #tpu.memory_space<vmem>>, vector<1x512xf32>,
      %c0_15 = arith.constant 0 : index
      %c0_16 = arith.constant 0 : index
      %23 = vector.load %arg11[%c0_15, %c0_16] : memref<1x512xf32, #tpu.memory_space<vmem>>, vector<1x512xf32>
      %24 = arith.mulf %6, %6 : vector<8x512xf32>
      %cst_17 = arith.constant dense<0.000000e+00> : vector<512xf32>
      %25 = vector.multi_reduction <add>, %24, %cst_17 [0] : vector<8x512xf32> to vector<512xf32>
      %26 = vector.shape_cast %25 : vector<512xf32> to vector<1x512xf32>
      %27 = arith.addf %23, %26 : vector<1x512xf32>
      %c0_18 = arith.constant 0 : index
      %c0_19 = arith.constant 0 : index
      %28 = vector.load %arg11[%c0_18, %c0_19] : memref<1x512xf32, #tpu.memory_space<vmem>>, vector<1x512xf32>
      tpu.vector_store %arg11[%c0_18, %c0_19], %27 {strides = array<i32>} : memref<1x512xf32, #tpu.memory_space<vmem>>, vector<1x512xf32>,
      %cst_20 = arith.constant 0.000000e+00 : f32
      %29 = vector.broadcast %cst_20 : f32 to vector<8x1xf32>
      %c0_21 = arith.constant 0 : index
      %c0_22 = arith.constant 0 : index
      %30 = vector.load %arg9[%c0_21, %c0_22] : memref<8x1xf32, #tpu.memory_space<vmem>>, vector<8x1xf32>
      tpu.vector_store %arg9[%c0_21, %c0_22], %29 {strides = array<i32>} : memref<8x1xf32, #tpu.memory_space<vmem>>, vector<8x1xf32>,
    } else {
    }
    %c1_i32 = arith.constant 1 : i32
    %15 = arith.cmpi eq, %arg0, %c1_i32 : i32
    %16 = arith.extui %15 : i1 to i32
    %c0_i32_9 = arith.constant 0 : i32
    %17 = arith.cmpi ne, %16, %c0_i32_9 : i32
    scf.if %17 {
      %c0_10 = arith.constant 0 : index
      %c0_11 = arith.constant 0 : index
      %18 = vector.load %arg10[%c0_10, %c0_11] : memref<1x512xf32, #tpu.memory_space<vmem>>, vector<1x512xf32>
      %cst_12 = arith.constant 1.250000e-01 : f32
      %19 = vector.broadcast %cst_12 : f32 to vector<1x512xf32>
      %20 = arith.mulf %18, %19 : vector<1x512xf32>
      %c0_13 = arith.constant 0 : index
      %c0_14 = arith.constant 0 : index
      %21 = vector.load %arg11[%c0_13, %c0_14] : memref<1x512xf32, #tpu.memory_space<vmem>>, vector<1x512xf32>
      %cst_15 = arith.constant 1.250000e-01 : f32
      %22 = vector.broadcast %cst_15 : f32 to vector<1x512xf32>
      %23 = arith.mulf %21, %22 : vector<1x512xf32>
      %24 = arith.mulf %20, %20 : vector<1x512xf32>
      %25 = arith.subf %23, %24 : vector<1x512xf32>
      %cst_16 = arith.constant 0.000000e+00 : f32
      %26 = vector.broadcast %cst_16 : f32 to vector<1x512xf32>
      %27 = arith.maximumf %25, %26 : vector<1x512xf32>
      %c0_17 = arith.constant 0 : index
      %c0_18 = arith.constant 0 : index
      %28 = vector.load %arg5[%c0_17, %c0_18] : memref<1x512xf32, #tpu.memory_space<vmem>>, vector<1x512xf32>
      %cst_19 = arith.constant 9.99999974E-6 : f32
      %29 = vector.broadcast %cst_19 : f32 to vector<1x512xf32>
      %30 = arith.addf %27, %29 : vector<1x512xf32>
      %31 = math.rsqrt %30 : vector<1x512xf32>
      %32 = arith.mulf %28, %31 : vector<1x512xf32>
      %c0_20 = arith.constant 0 : index
      %c0_21 = arith.constant 0 : index
      %33 = vector.load %arg6[%c0_20, %c0_21] : memref<1x512xf32, #tpu.memory_space<vmem>>, vector<1x512xf32>
      %34 = arith.mulf %20, %32 : vector<1x512xf32>
      %35 = arith.subf %33, %34 : vector<1x512xf32>
      %36 = vector.broadcast %32 : vector<1x512xf32> to vector<8x512xf32>
      %37 = arith.mulf %6, %36 : vector<8x512xf32>
      %38 = vector.broadcast %35 : vector<1x512xf32> to vector<8x512xf32>
      %39 = arith.addf %37, %38 : vector<8x512xf32>
      %cst_22 = arith.constant 0.000000e+00 : f32
      %40 = vector.broadcast %cst_22 : f32 to vector<8x512xf32>
      %41 = arith.maximumf %39, %40 : vector<8x512xf32>
      %c0_23 = arith.constant 0 : index
      %c0_24 = arith.constant 0 : index
      %42 = vector.load %arg7[%c0_23, %c0_24] : memref<1x512xf32, #tpu.memory_space<vmem>>, vector<1x512xf32>
      %43 = vector.broadcast %42 : vector<1x512xf32> to vector<8x512xf32>
      %44 = arith.mulf %41, %43 : vector<8x512xf32>
      %cst_25 = arith.constant dense<0.000000e+00> : vector<8xf32>
      %45 = vector.multi_reduction <add>, %44, %cst_25 [1] : vector<8x512xf32> to vector<8xf32>
      %46 = vector.shape_cast %45 : vector<8xf32> to vector<8x1xf32>
      %c0_26 = arith.constant 0 : index
      %c0_27 = arith.constant 0 : index
      %47 = vector.load %arg8[%c0_26, %c0_27] : memref<1x1xf32, #tpu.memory_space<vmem>>, vector<1x1xf32>
      %48 = vector.broadcast %47 : vector<1x1xf32> to vector<8x1xf32>
      %49 = arith.addf %46, %48 : vector<8x1xf32>
      %50 = arith.negf %49 : vector<8x1xf32>
      %51 = math.exp %50 : vector<8x1xf32>
      %cst_28 = arith.constant 1.000000e+00 : f32
      %52 = vector.broadcast %cst_28 : f32 to vector<8x1xf32>
      %53 = arith.addf %52, %51 : vector<8x1xf32>
      %54 = arith.divf %52, %53 : vector<8x1xf32>
      %c0_29 = arith.constant 0 : index
      %c0_30 = arith.constant 0 : index
      %55 = vector.load %arg9[%c0_29, %c0_30] : memref<8x1xf32, #tpu.memory_space<vmem>>, vector<8x1xf32>
      tpu.vector_store %arg9[%c0_29, %c0_30], %54 {strides = array<i32>} : memref<8x1xf32, #tpu.memory_space<vmem>>, vector<8x1xf32>,
    } else {
    }
    return
  }
  func.func @transform_0(%arg0: i32, %arg1: i32) -> (i32, i32) {
    %c0_i32 = arith.constant 0 : i32
    %c0_i32_0 = arith.constant 0 : i32
    return %arg1, %c0_i32 : i32, i32
  }
  func.func @transform_1(%arg0: i32, %arg1: i32) -> (i32, i32) {
    %c0_i32 = arith.constant 0 : i32
    %c0_i32_0 = arith.constant 0 : i32
    %c0_i32_1 = arith.constant 0 : i32
    return %c0_i32, %c0_i32_0 : i32, i32
  }
  func.func @transform_2(%arg0: i32, %arg1: i32) -> (i32, i32) {
    %c0_i32 = arith.constant 0 : i32
    %c0_i32_0 = arith.constant 0 : i32
    %c0_i32_1 = arith.constant 0 : i32
    return %c0_i32, %c0_i32_0 : i32, i32
  }
  func.func @transform_3(%arg0: i32, %arg1: i32) -> (i32, i32) {
    %c0_i32 = arith.constant 0 : i32
    %c0_i32_0 = arith.constant 0 : i32
    %c0_i32_1 = arith.constant 0 : i32
    return %c0_i32, %c0_i32_0 : i32, i32
  }
  func.func @transform_4(%arg0: i32, %arg1: i32) -> (i32, i32) {
    %c0_i32 = arith.constant 0 : i32
    %c0_i32_0 = arith.constant 0 : i32
    %c0_i32_1 = arith.constant 0 : i32
    return %c0_i32, %c0_i32_0 : i32, i32
  }
  func.func @transform_5(%arg0: i32, %arg1: i32) -> (i32, i32) {
    %c0_i32 = arith.constant 0 : i32
    %c0_i32_0 = arith.constant 0 : i32
    %c0_i32_1 = arith.constant 0 : i32
    return %c0_i32, %c0_i32_0 : i32, i32
  }
  func.func @transform_6(%arg0: i32, %arg1: i32) -> (i32, i32) {
    %c0_i32 = arith.constant 0 : i32
    %c0_i32_0 = arith.constant 0 : i32
    %c0_i32_1 = arith.constant 0 : i32
    return %c0_i32, %c0_i32_0 : i32, i32
  }
  func.func @transform_7(%arg0: i32, %arg1: i32) -> (i32, i32) {
    %c0_i32 = arith.constant 0 : i32
    %c0_i32_0 = arith.constant 0 : i32
    return %arg1, %c0_i32 : i32, i32
  }
}

</mosaic_0001>

<bundles_post_ra>
// kernel: tpu_custom_call.1
= control target key start
LH: loop header
LB: loop body
LE: loop exit
PB: predicated region body
PF: predicated region fallthrough
CT: control target
= control target key end

     0   :  { %s1290_s0 = inlined_call_operand.hbm [shape: f32[8,24], index: 0, kind: input, shape index: {}]   ;;  %s1291_s1 = inlined_call_operand.hbm [shape: bf16[24,512], index: 1, kind: input, shape index: {}]   ;;  %s1292_s2 = inlined_call_operand.hbm [shape: f32[1,512], index: 2, kind: input, shape index: {}]   ;;  %s1293_s3 = inlined_call_operand.vmem [shape: f32[1,512], index: 3, kind: input, shape index: {}]   ;;  %s1294_s4 = inlined_call_operand.hbm [shape: f32[1,512], index: 4, kind: input, shape index: {}]   ;;  %s1295_s5 = inlined_call_operand.hbm [shape: f32[1,512], index: 5, kind: input, shape index: {}]   ;;  %s1296_s6 = inlined_call_operand.<no memory space> [shape: f32[1,1], index: 6, kind: input, shape index: {}]   ;;  %s1297_s7 = inlined_call_operand.vmem [shape: f32[8,1], index: 7, kind: output, shape index: {}]  }
   0x1   :  { %v12_v0 = vstv %s1296_s6 }
   0x2   :  { %13 = vst [vmem:[#allocation4] sm:$0x1] %v12_v0 }
   0x3   :  { %14 = vsyncpa [#allocation6], 0 }
   0x4   :  { %15 = vsyncpa [#allocation8], 0 }
   0x5   :  { %16 = vsyncpa [#allocation11], 0  ;;  %s1145_s26 = smov 0   ;;  %s1147_s27 = smov 0  }
   0x6   :  { %s1149_s28 = smov 0  }
   0x7 LB: > { %s242_s30 = sshll.u32 %s1291_s1, 4  ;;  %s776_s8 = sadd.s32 4294967295, %s1091_s28   ;;  %s1091_s28 = sphi %s1149_s28, %s22_s28   ;;  %s1087_s27 = sphi %s1147_s27, %s1304_s27   ;;  %s1083_s26 = sphi %s1145_s26, %s1303_s26   ;;  %s243_s30 = int_to_ptr.hbm [resolvable:$true] %s242_s30 }
   0x8   : > { %p777_p0 = scmp.ge.s32.totalorder %s1091_s28, 1  ;;  %p217_p1 = scmp.lt.s32.totalorder %s1091_s28, 3 }
   0x9   : > { %p1166_p2 = scmp.eq.s32.totalorder %s776_s8, 0  ;;  %s1093_s11 = smov [#allocation7]  }
   0xa   : > { %p1170_p3 = pnand %p777_p0, %p217_p1  ;;  %s244_s12 = sshll.u32 %s1093_s11, 4  ;;  %s245_s12 = int_to_ptr.vmem [resolvable:$true] %s244_s12 }
   0xb   : > { %s272_s15 = sshll.u32 %s1294_s4, 4  ;;  %s1094_s17 = smov [#allocation10]   ;;  %s273_s15 = int_to_ptr.hbm [resolvable:$true] %s272_s15 }
   0xc   : > { %p841_p4 = pneg %p1170_p3  ;;  %s274_s18 = sshll.u32 %s1094_s17, 4  ;;  %s275_s18 = int_to_ptr.vmem [resolvable:$true] %s274_s18 }
   0xd   : > { %s1095_s19 = smov 256   ;;  %s1096_s20 = smov 16  }
   0xe   : > { %p1181_p5 = pnand %p1166_p2, %p841_p4  ;;  %s231_s23 = sshll.u32 %s1290_s0, 4  ;;  %s232_s23 = int_to_ptr.hbm [resolvable:$true] %s231_s23 }
   0xf   : > { %s34_s24 = sadd.s32 1, %s1087_s27  ;;  %s1097_s25 = smov [#allocation5]  }
  0x10   : > { %847 = dma.hbm_to_vmem [thread:$0]  (!%p1181_p5), %s243_s30, 768, %s245_s12, [#allocation8], %s1095_s19, %s1095_s19, %s1096_s20  }
  0x11   : > { %853 = dma.hbm_to_vmem [thread:$0]  (!%p1181_p5), %s273_s15, 64, %s275_s18, [#allocation11]  }
  0x12   : > { %p36_p6 = scmp.ge.s32.totalorder %s34_s24, 2  ;;  %s233_s6 = sshll.u32 %s1097_s25, 4  ;;  %s234_s6 = int_to_ptr.vmem [resolvable:$true] %s233_s6 }
  0x13   : > { %s257_s11 = sshll.u32 %s1292_s2, 4  ;;  %s284_s13 = sshll.u32 %s1295_s5, 4  ;;  %s258_s11 = int_to_ptr.hbm [resolvable:$true] %s257_s11  ;;  %s285_s13 = int_to_ptr.hbm [resolvable:$true] %s284_s13 }
  0x14   : > { %s1306_s24 = smov (%p36_p6, %s34_s24), 0  ;;  %s1098_s14 = smov [#allocation9]  }
  0x15   : > { %844 = dma.hbm_to_vmem [thread:$0]  (!%p1181_p5), %s232_s23, 128, %s234_s6, [#allocation6]  }
  0x16   : > { %s259_s15 = sshll.u32 %s1098_s14, 4  ;;  %s1099_s17 = smov [#allocation12]   ;;  %s260_s15 = int_to_ptr.vmem [resolvable:$true] %s259_s15 }
  0x17   : > { %850 = dma.hbm_to_vmem [thread:$0]  (!%p1181_p5), %s258_s11, 64, %s260_s15, [#allocation8]  }
  0x18   : > { %s286_s18 = sshll.u32 %s1099_s17, 4  ;;  %302 = sbr.rel (%p1170_p3) target bundleno = 423 (0x1a7), region = 48  ;;  %s287_s18 = int_to_ptr.vmem [resolvable:$true] %s286_s18 }
  0x19   : > { %856 = dma.hbm_to_vmem [thread:$0]  (!%p1181_p5), %s285_s13, 64, %s287_s18, [#allocation11]  }
  0x1d   : > { %1070 = dma.done.wait (%p1166_p2), [#allocation6], 128  }
  0x1e   : > { %1072 = vsyncadd (%p1166_p2), [#allocation6], 4294967168 }
  0x1f   : > { %1074 = dma.done.wait (%p1166_p2), [#allocation8], 832  }
  0x20   : > { %1076 = vsyncadd (%p1166_p2), [#allocation8], 4294966464 }
  0x21   : > { %1078 = dma.done.wait (%p1166_p2), [#allocation11], 128  }
  0x22   : > { %1080 = vsyncadd (%p1166_p2), [#allocation11], 4294967168  ;;  %v361_v1 = vld [vmem:[#allocation7 + $0x20] sm:$0xff]  ;;  %v362_v2 = vld [vmem:[#allocation7 + $0x28] sm:$0xff]  ;;  %vm406_vm0 = vcmask 1043456   ;;  %vm402_vm1 = vcmask 195584  }
  0x23   : > { %v386_v3 = vunpack.c.l.b16 %v361_v1  ;;  %v387_v4 = vunpack.c.h.b16 %v361_v1  ;;  %v388_v5 = vunpack.c.l.b16 %v362_v2  ;;  %v389_v6 = vunpack.c.h.b16 %v362_v2  ;;  %v791_v7 = vld [vmem:[#allocation7] sm:$0xf]  ;;  %v818_v8 = vld [vmem:[#allocation7 + $0xc] sm:$0xf0]  ;;  %v816_v13 = vld [vmem:[#allocation7 + $0x4] sm:$0xf] }
  0x24   : > { %v793_v14 = vld [vmem:[#allocation7 + $0x10] sm:$0xf0]  ;;  %v799_v15 = vld [vmem:[#allocation7 + $0x8] sm:$0xf]  ;;  %v819_v16 = vld [vmem:[#allocation7 + $0x14] sm:$0xf0]  ;;  %v792_v23 = vor.u32 %v818_v8, %v791_v7 }
  0x25   : > { %v394_v9 = vpack.c.b16 %v386_v3, %v386_v3  ;;  %v395_v10 = vpack.c.b16 %v387_v4, %v387_v4  ;;  %v396_v11 = vpack.c.b16 %v388_v5, %v388_v5  ;;  %v397_v12 = vpack.c.b16 %v389_v6, %v389_v6  ;;  %v817_v17 = vld [vmem:[#allocation7 + $0xc] sm:$0xf]  ;;  %v801_v18 = vld [vmem:[#allocation7 + $0x18] sm:$0xf0]  ;;  %p471_p7 = scmp.eq.s32.totalorder %s1083_s26, 0 }
  0x26   : > { %v796_v24 = vor.u32 %v816_v13, %v793_v14  ;;  %v355_v25 = vld [vmem:[#allocation5] sm:$0xff]  ;;  %v800_v26 = vor.u32 %v819_v16, %v799_v15  ;;  %v804_v27 = vor.u32 %v817_v17, %v801_v18  ;;  %v354_v29 = vld [vmem:[#allocation9] sm:$0xf]  ;;  %v477_v46 = vlaneseq (%p471_p7) }
  0x27   : > { %v408_v19 = vsel %vm406_vm0, %v394_v9, 0  ;;  %v411_v20 = vsel %vm406_vm0, %v395_v10, 0  ;;  %v414_v21 = vsel %vm406_vm0, %v396_v11, 0  ;;  %v417_v22 = vsel %vm406_vm0, %v397_v12, 0 }
  0x28   : > { %425 = vmatpush.bf16.msra.mxu0 %v408_v19  ;;  %438 = vmatpush.bf16.msra.mxu1 %v411_v20  ;;  %v356_v28 = vpack.c.bf16 %v355_v25, %v355_v25  ;;  %v364_v30 = vperm.slane %v354_v29, 0  ;;  %v365_v31 = vperm.slane %v354_v29, 1  ;;  %v366_v36 = vperm.slane %v354_v29, 2 }
  0x29   : > { %451 = vmatpush.bf16.msra.mxu2 %v414_v21  ;;  %464 = vmatpush.bf16.msra.mxu3 %v417_v22  ;;  %v367_v37 = vperm.slane %v354_v29, 3  ;;  %vm479_vm2 = vcmp.lt.s32.totalorder (%p471_p7), %v477_v46, 512  ;;  %v1100_v47 = vmov (%p471_p7), 0.0  }
  0x2a   : > { %481 = vst.msk [vmem:[#allocation2] sm:$0xf] (%p471_p7), %vm479_vm2, %v1100_v47 }
  0x2b   : > { %482 = vst.msk [vmem:[#allocation3] sm:$0xf] (%p471_p7), %vm479_vm2, %v1100_v47 }
  0x2c   : > { %426 = vmatpush.bf16.msra.mxu0 %v792_v23  ;;  %439 = vmatpush.bf16.msra.mxu1 %v796_v24 }
  0x2d   : > { %452 = vmatpush.bf16.msra.mxu2 %v800_v26  ;;  %465 = vmatpush.bf16.msra.mxu3 %v804_v27 }
  0x2f   : > { %805 = vmatmul.msk.bf16.vlgmr.msra.gmra.mxu0 %vm402_vm1, %v356_v28  ;;  %806 = vmatmul.msk.bf16.vlgmr.msra.gmra.mxu1 %vm402_vm1, %v356_v28 }
  0x30   : > { %807 = vmatmul.msk.bf16.vlgmr.msra.gmra.mxu2 %vm402_vm1, %v356_v28  ;;  %808 = vmatmul.msk.bf16.vlgmr.msra.gmra.mxu3 %vm402_vm1, %v356_v28 }
  0xac   : > { %v428_v32 = vpop.f32.mrf.mxu0  ;;  %v441_v33 = vpop.f32.mrf.mxu1 }
  0xad   : > { %v1226_v34 = vadd.f32 %v428_v32, %v364_v30  ;;  %v1228_v35 = vadd.f32 %v441_v33, %v365_v31 }
  0xb3   : > { %v454_v38 = vpop.f32.mrf.mxu2  ;;  %v467_v39 = vpop.f32.mrf.mxu3 }
  0xb4   : > { %v1230_v40 = vadd.f32 %v454_v38, %v366_v36  ;;  %v1232_v41 = vadd.f32 %v467_v39, %v367_v37  ;;  %v430_v42 = vpop.f32.mrf.mxu0  ;;  %v443_v43 = vpop.f32.mrf.mxu1 }
  0xb7   : > { %476 = sbr.rel (!%p471_p7) target bundleno = 188 (0xbc), region = 72 }
  0xbb   : > { %v456_v44 = vpop.f32.mrf.mxu2  ;;  %v469_v45 = vpop.f32.mrf.mxu3 }
  0xbc PF: > { %p810_p8 = scmp.ne.s32.totalorder %s1083_s26, 0 }
  0xbe   : > { %485 = sbr.rel (%p810_p8) target bundleno = 220 (0xdc), region = 76 }
  0xc3   : > { %v487_v48 = vrot.slane %v1226_v34, 4  ;;  %v493_v49 = vrot.slane %v1228_v35, 4  ;;  %v499_v50 = vrot.slane %v1230_v40, 4  ;;  %v505_v51 = vrot.slane %v1232_v41, 4  ;;  %v486_v31 = vld [vmem:[#allocation2] sm:$0xf] }
  0xc4   : > { %vm518_vm3 = vcmask 1040384   ;;  %vm520_vm4 = vcmask 1042434   ;;  %v526_v56 = vlaneseq  ;;  %v532_v57 = vmul.f32 %v1226_v34, %v1226_v34 }
  0xc5   : > { %v488_v52 = vadd.f32 %v487_v48, %v1226_v34  ;;  %v494_v53 = vadd.f32 %v493_v49, %v1228_v35  ;;  %v500_v54 = vadd.f32 %v499_v50, %v1230_v40  ;;  %v506_v55 = vadd.f32 %v505_v51, %v1232_v41 }
  0xc6   : > { %v533_v58 = vmul.f32 %v1228_v35, %v1228_v35  ;;  %v534_v59 = vmul.f32 %v1230_v40, %v1230_v40  ;;  %vm522_vm5 = vcmask 1041408   ;;  %v535_v0 = vmul.f32 %v1232_v41, %v1232_v41 }
  0xc7   : > { %v489_v60 = vrot.slane %v488_v52, 2  ;;  %v495_v61 = vrot.slane %v494_v53, 2  ;;  %v501_v62 = vrot.slane %v500_v54, 2  ;;  %v507_v63 = vrot.slane %v506_v55, 2 }
  0xc8   : > { %v536_v1 = vrot.slane %v532_v57, 4  ;;  %v542_v2 = vrot.slane %v533_v58, 4  ;;  %v548_v3 = vrot.slane %v534_v59, 4  ;;  %v554_v11 = vrot.slane %v535_v0, 4 }
  0xc9   : > { %v490_v4 = vadd.f32 %v489_v60, %v488_v52  ;;  %v496_v5 = vadd.f32 %v495_v61, %v494_v53  ;;  %v502_v6 = vadd.f32 %v501_v62, %v500_v54  ;;  %v508_v7 = vadd.f32 %v507_v63, %v506_v55  ;;  %v531_v55 = vld [vmem:[#allocation3] sm:$0xf] }
  0xca   : > { %v537_v8 = vadd.f32 %v536_v1, %v532_v57  ;;  %v543_v9 = vadd.f32 %v542_v2, %v533_v58  ;;  %v549_v10 = vadd.f32 %v548_v3, %v534_v59  ;;  %v555_v19 = vadd.f32 %v554_v11, %v535_v0 }
  0xcb   : > { %v491_v12 = vrot.slane %v490_v4, 1  ;;  %v497_v13 = vrot.slane %v496_v5, 1  ;;  %v503_v14 = vrot.slane %v502_v6, 1  ;;  %v509_v15 = vrot.slane %v508_v7, 1 }
  0xcc   : > { %v538_v16 = vrot.slane %v537_v8, 2  ;;  %v544_v17 = vrot.slane %v543_v9, 2  ;;  %v550_v18 = vrot.slane %v549_v10, 2  ;;  %v556_v27 = vrot.slane %v555_v19, 2 }
  0xcd   : > { %v492_v20 = vadd.f32 %v491_v12, %v490_v4  ;;  %v498_v21 = vadd.f32 %v497_v13, %v496_v5  ;;  %v504_v22 = vadd.f32 %v503_v14, %v502_v6  ;;  %v510_v23 = vadd.f32 %v509_v15, %v508_v7 }
  0xce   : > { %v539_v24 = vadd.f32 %v538_v16, %v537_v8  ;;  %v545_v25 = vadd.f32 %v544_v17, %v543_v9  ;;  %v551_v26 = vadd.f32 %v550_v18, %v549_v10  ;;  %vm573_vm6 = vcmask 7168  }
  0xcf   : > { %v515_v28 = vrot.slane %v498_v21, 7  ;;  %v516_v29 = vrot.slane %v504_v22, 6  ;;  %v517_v30 = vrot.slane %v510_v23, 5  ;;  %v557_v37 = vadd.f32 %v556_v27, %v555_v19 }
  0xd0   : > { %v540_v32 = vrot.slane %v539_v24, 1  ;;  %v546_v33 = vrot.slane %v545_v25, 1  ;;  %v552_v36 = vrot.slane %v551_v26, 1  ;;  %vm1256_vm7 = vcmp.lt.s32.totalorder %v526_v56, 512 }
  0xd1   : > { %v519_v38 = vsel %vm518_vm3, %v492_v20, %v515_v28  ;;  %v521_v39 = vsel %vm520_vm4, %v516_v29, %v517_v30  ;;  %v1101_v46 = vmov 0.0   ;;  %v558_v49 = vrot.slane %v557_v37, 1 }
  0xd2   : > { %v523_v42 = vsel %vm522_vm5, %v519_v38, %v521_v39  ;;  %v547_v44 = vadd.f32 %v546_v33, %v545_v25  ;;  %v553_v45 = vadd.f32 %v552_v36, %v551_v26  ;;  %574 = vst.msk [vmem:[%s1297_s7] sm:$0xff] %vm573_vm6, %v1101_v46  ;;  %v541_v48 = vadd.f32 %v540_v32, %v539_v24 }
  0xd3   : > { %v525_v47 = vadd.f32 %v523_v42, %v486_v31  ;;  %v559_v51 = vadd.f32 %v558_v49, %v557_v37 }
  0xd4   : > { %v564_v50 = vrot.slane %v547_v44, 7  ;;  %v565_v52 = vrot.slane %v553_v45, 6 }
  0xd5   : > { %530 = vst.msk [vmem:[#allocation2] sm:$0xf] %vm1256_vm7, %v525_v47  ;;  %v566_v53 = vrot.slane %v559_v51, 5 }
  0xd6   : > { %v567_v54 = vsel %vm518_vm3, %v541_v48, %v564_v50 }
  0xd7   : > { %v568_v56 = vsel %vm520_vm4, %v565_v52, %v566_v53 }
  0xd8   : > { %v569_v57 = vsel %vm522_vm5, %v567_v54, %v568_v56 }
  0xd9   : > { %v571_v58 = vadd.f32 %v569_v57, %v531_v55 }
  0xdb   : > { %572 = vst.msk [vmem:[#allocation3] sm:$0xf] %vm1256_vm7, %v571_v58 }
  0xdc PF: > { %p811_p9 = scmp.ne.s32.totalorder %s1083_s26, 1 }
  0xde   : > { %578 = sbr.rel (%p811_p9) target bundleno = 423 (0x1a7), region = 80 }
  0xe3   : > { %v579_v59 = vld [vmem:[#allocation2] sm:$0xf]  ;;  %v581_v60 = vld [vmem:[#allocation3] sm:$0xf]  ;;  %v632_v22 = vld [vmem:[#allocation12] sm:$0xf] }
  0xe4   : > { %v580_v61 = vmul.f32 0.125, %v579_v59  ;;  %v582_v62 = vmul.f32 0.125, %v581_v60  ;;  %v586_v8 = vld [vmem:[%s1293_s3] sm:$0xf]  ;;  %v599_v12 = vld [vmem:[#allocation10] sm:$0xf] }
  0xe5   : > { %v634_v28 = vperm.slane %v632_v22, 0  ;;  %v635_v29 = vperm.slane %v632_v22, 1  ;;  %v636_v30 = vperm.slane %v632_v22, 2  ;;  %v637_v37 = vperm.slane %v632_v22, 3  ;;  %v900_v47 = vld [vmem:[#allocation4] ss:$0 sm:$0xff] }
  0xe6   : > { %v583_v63 = vmul.f32 %v580_v61, %v580_v61  ;;  %vm675_vm14 = vcmask 7168  }
  0xe8   : > { %v584_v0 = vsub.f32 %v582_v62, %v583_v63 }
  0xea   : > { %v585_v1 = vmax.f32 %v584_v0, 0.0 }
  0xec   : > { %v587_v2 = vadd.f32 1e-05, %v585_v1 }
  0xee   : > { %901 = vrsqrt.f32 %v587_v2  ;;  %vm594_vm8 = vweird.f32 %v587_v2 }
  0xf4   : > { %v902_v3 = vpop.eup %901 }
  0xf5   : > { %v589_v4 = vmul.f32 %v902_v3, %v587_v2  ;;  %vm595_vm9 = vweird.f32 %v902_v3 }
  0xf6   : > { %vm596_vm10 = vmor %vm594_vm8, %vm595_vm9 }
  0xf7   : > { %v590_v5 = vmul.f32 %v902_v3, %v589_v4 }
  0xf9   : > { %v591_v6 = vmul.f32 0.5, %v590_v5 }
  0xfb   : > { %v592_v7 = vsub.f32 1.5, %v591_v6 }
  0xfd   : > { %v593_v9 = vmul.f32 %v902_v3, %v592_v7 }
  0xff   : > { %v597_v10 = vsel %vm596_vm10, %v902_v3, %v593_v9 }
 0x100   : > { %v598_v11 = vmul.f32 %v597_v10, %v586_v8 }
 0x102   : > { %v600_v13 = vmul.f32 %v598_v11, %v580_v61  ;;  %v603_v14 = vperm.slane %v598_v11, 0  ;;  %v604_v15 = vperm.slane %v598_v11, 1  ;;  %v605_v16 = vperm.slane %v598_v11, 2 }
 0x103   : > { %v606_v17 = vperm.slane %v598_v11, 3 }
 0x104   : > { %v601_v18 = vsub.f32 %v599_v12, %v600_v13  ;;  %v611_v19 = vmul.f32 %v603_v14, %v1226_v34  ;;  %v612_v20 = vmul.f32 %v604_v15, %v1228_v35  ;;  %v613_v21 = vmul.f32 %v605_v16, %v1230_v40 }
 0x105   : > { %v614_v23 = vmul.f32 %v606_v17, %v1232_v41 }
 0x106   : > { %v616_v24 = vperm.slane %v601_v18, 0  ;;  %v617_v25 = vperm.slane %v601_v18, 1  ;;  %v618_v26 = vperm.slane %v601_v18, 2  ;;  %v619_v27 = vperm.slane %v601_v18, 3 }
 0x108   : > { %v624_v31 = vadd.f32 %v616_v24, %v611_v19  ;;  %v625_v32 = vadd.f32 %v617_v25, %v612_v20  ;;  %v626_v33 = vadd.f32 %v618_v26, %v613_v21  ;;  %v627_v36 = vadd.f32 %v619_v27, %v614_v23 }
 0x10a   : > { %v628_v34 = vmax.f32 %v624_v31, 0.0  ;;  %v629_v38 = vmax.f32 %v625_v32, 0.0  ;;  %v630_v35 = vmax.f32 %v626_v33, 0.0  ;;  %v631_v39 = vmax.f32 %v627_v36, 0.0 }
 0x10c   : > { %v642_v40 = vmul.f32 %v634_v28, %v628_v34  ;;  %v643_v42 = vmul.f32 %v635_v29, %v629_v38  ;;  %v644_v43 = vmul.f32 %v636_v30, %v630_v35  ;;  %v645_v41 = vmul.f32 %v637_v37, %v631_v39 }
 0x10e   : > { %v646_v44 = vadd.f32 %v643_v42, %v642_v40 }
 0x110   : > { %v647_v45 = vadd.f32 %v646_v44, %v644_v43 }
 0x112   : > { %v648_v46 = vadd.f32 %v647_v45, %v645_v41 }
 0x114   : > { %649 = vadd.xlane.f32.xlu0 %v648_v46 }
 0x187   : > { %v650_v48 = vpop.xlane.xlu0 %649 }
 0x188   : > { %v655_v49 = vadd.f32 %v900_v47, %v650_v48 }
 0x18a   : > { %v812_v50 = vmul.f32 -1.442695, %v655_v49 }
 0x18c   : > { %903 = vpow2.f32 %v812_v50 }
 0x192   : > { %v904_v51 = vpop.eup %903 }
 0x193   : > { %v659_v52 = vadd.f32 1.0, %v904_v51 }
 0x195   : > { %905 = vrcp.f32 %v659_v52  ;;  %v671_v56 = vand.u32 2147483648, %v659_v52  ;;  %v669_v58 = vand.u32 2147483647, %v659_v52  ;;  %vm665_vm12 = vweird.f32 %v659_v52 }
 0x197   : > { %v672_v60 = vor.u32 1.1754944e-38, %v671_v56  ;;  %vm670_vm15 = vcmp.eq.f32.partialorder %v669_v58, 8.507059e+37 }
 0x19b   : > { %v906_v53 = vpop.eup %905 }
 0x19c   : > { %v661_v54 = vmul.f32 %v906_v53, %v659_v52  ;;  %vm666_vm11 = vweird.f32 %v906_v53 }
 0x19d   : > { %vm667_vm13 = vmor %vm665_vm12, %vm666_vm11 }
 0x19e   : > { %v662_v55 = vsub.f32 1.0, %v661_v54 }
 0x1a0   : > { %v663_v57 = vmul.f32 %v906_v53, %v662_v55 }
 0x1a2   : > { %v664_v59 = vadd.f32 %v906_v53, %v663_v57 }
 0x1a4   : > { %v668_v61 = vsel %vm667_vm13, %v906_v53, %v664_v59 }
 0x1a5   : > { %v673_v62 = vsel %vm670_vm15, %v672_v60, %v668_v61 }
 0x1a6   : > { %676 = vst.msk [vmem:[%s1297_s7] sm:$0xff] %vm675_vm14, %v673_v62 }
 0x1a7 PF: > { %s22_s28 = sadd.s32 1, %s1091_s28   ;;  %s1303_s26 = smov %s1087_s27 }
 0x1a8   : > { %p19_p10 = scmp.ge.s32.totalorder %s22_s28, 4   ;;  %s1304_s27 = smov %s1306_s24 }
 0x1aa   :  { %21 = sbr.rel (!%p19_p10) target bundleno = 7 (0x7), region = 109 }
 0x1af   :  { %696 = vsyncpa [#allocation6], 1 }
 0x1b0   :  { %698 = vsyncpa [#allocation6 + $0x1], 1 }
 0x1b1   :  { %699 = vsyncpa [#allocation8], 1 }
 0x1b2   :  { %700 = vsyncpa [#allocation11], 1 }

</bundles_post_ra>
